<compile_context>
chip_gen: v6e
topology: v6e:2x2x1
jax: 0.10.0
libtpu: 0.0.40
codegen_flags: <defaults>
</compile_context>

<pallas_src>
import math
from functools import partial

import jax
import jax.numpy as jnp
from jax.experimental import pallas as pl
from jax.experimental.pallas import tpu as pltpu


# ----------------------------- in-kernel helpers -----------------------------

def _layernorm(x, w, b, eps=1e-6):
    # PyTorch LayerNorm semantics (biased variance), eps=1e-6 — f32 math
    mu = jnp.mean(x, axis=-1, keepdims=True)
    xc = x - mu
    var = jnp.mean(xc * xc, axis=-1, keepdims=True)
    inv = jax.lax.rsqrt(var + eps)
    return xc * inv * w + b


def _gelu_exact(x):
    # nn.GELU default (erf form) — f32 math
    return 0.5 * x * (1.0 + jax.lax.erf(x * (1.0 / math.sqrt(2.0))))


def _softmax_lastdim(s):
    m = jnp.max(s, axis=-1, keepdims=True)
    e = jnp.exp(s - m)
    return e * pl.reciprocal(jnp.sum(e, axis=-1, keepdims=True), approx=True)


# ------------------------------- fused decoder kernel -------------------------------

def decoder_kernel(num_heads,
                   x_ref,
                   ln1_w, ln1_b, qkv_w, qkv_b, proj_w, proj_b,
                   ln2_w, ln2_b, fc1_w, fc1_b, fc2_w, fc2_b,
                   norm_w, norm_b, head_w, head_b,
                   o_ref,
                   x_acc):
    """Grid = (batch, layer).  One grid step == one ViT block for one batch element.
    x_acc (f32 VMEM scratch) carries the residual stream across the layer axis; the final
    LayerNorm + head are applied and written out at the last layer step."""
    layer = pl.program_id(1)
    n_layers = pl.num_programs(1)

    @pl.when(layer == 0)
    def _():
        x_acc[...] = x_ref[0].astype(jnp.float32)

    x = x_acc[...]                               # (N, D) f32 residual stream
    N, D = x.shape
    H = num_heads
    Dh = D // H
    scale = Dh ** -0.5

    # hoist per-layer weight reads (read each ref once)
    w_ln1, b_ln1 = ln1_w[0], ln1_b[0]
    w_qkv, b_qkv = qkv_w[0], qkv_b[0]
    w_proj, b_proj = proj_w[0], proj_b[0]
    w_ln2, b_ln2 = ln2_w[0], ln2_b[0]
    w_fc1, b_fc1 = fc1_w[0], fc1_b[0]
    w_fc2, b_fc2 = fc2_w[0], fc2_b[0]

    # ---- multi-head self attention ----
    h = _layernorm(x, w_ln1, b_ln1)
    hb = h.astype(jnp.bfloat16)
    # one big matmul, contraction = D
    qkv = jnp.dot(hb, w_qkv, preferred_element_type=jnp.float32) + b_qkv      # (N, 3D) f32

    head_outs = []
    for hd in range(H):                                                       # static unroll
        q = (qkv[:, hd * Dh:(hd + 1) * Dh] * scale).astype(jnp.bfloat16)      # scale folded into q
        k = qkv[:, D + hd * Dh:D + (hd + 1) * Dh].astype(jnp.bfloat16)
        v = qkv[:, 2 * D + hd * Dh:2 * D + (hd + 1) * Dh].astype(jnp.bfloat16)
        # q @ k.T without an explicit transpose
        s = jax.lax.dot_general(q, k, (((1,), (1,)), ((), ())),
                                preferred_element_type=jnp.float32)           # (N, N) f32
        a = _softmax_lastdim(s).astype(jnp.bfloat16)
        head_outs.append(jnp.dot(a, v, preferred_element_type=jnp.float32))   # (N, Dh) f32
    o = jnp.concatenate(head_outs, axis=-1)                                   # (N, D)
    # ONE output projection, contraction = D
    x = x + jnp.dot(o.astype(jnp.bfloat16), w_proj,
                    preferred_element_type=jnp.float32) + b_proj

    # ---- MLP ----
    h2 = _layernorm(x, w_ln2, b_ln2).astype(jnp.bfloat16)
    f1 = jnp.dot(h2, w_fc1, preferred_element_type=jnp.float32) + b_fc1       # (N, 4D) f32
    g = _gelu_exact(f1).astype(jnp.bfloat16)
    x = x + jnp.dot(g, w_fc2, preferred_element_type=jnp.float32) + b_fc2

    x_acc[...] = x

    # ---- final LayerNorm + head (only at the last layer step) ----
    @pl.when(layer == n_layers - 1)
    def _():
        hf = _layernorm(x, norm_w[...], norm_b[...])
        o_ref[0] = (jnp.dot(hf.astype(jnp.bfloat16), head_w[...],
                            preferred_element_type=jnp.float32)
                    + head_b[...]).astype(o_ref.dtype)

    # TODO(synk): for large N (real MAE decoder, N >= 196) tile the MLP over tokens and use an
    # online-softmax (flash) structure instead of materializing the full (N, N) score matrix.


# ------------------------------- wrapper -------------------------------

def mae_vit_decoder_forward(x, params, num_heads):
    B, N, D = x.shape
    blocks = params["blocks"]
    L = len(blocks)

    def stack(name, dtype=None):
        w = jnp.stack([blk[name] for blk in blocks], axis=0)
        return w.astype(dtype) if dtype is not None else w

    # matmul weights -> bf16 (halves weight HBM/VMEM traffic, enables MXU bf16 peak);
    # LayerNorm params and biases stay f32.
    stacked = [
        stack("ln1_w"), stack("ln1_b"),
        stack("qkv_w", jnp.bfloat16), stack("qkv_b"),
        stack("proj_w", jnp.bfloat16), stack("proj_b"),
        stack("ln2_w"), stack("ln2_b"),
        stack("fc1_w", jnp.bfloat16), stack("fc1_b"),
        stack("fc2_w", jnp.bfloat16), stack("fc2_b"),
    ]

    norm_w, norm_b = params["norm_w"], params["norm_b"]
    head_w, head_b = params["head_w"], params["head_b"]
    C = head_w.shape[1]
    Cp = ((C + 127) // 128) * 128          # lane-dense head output (pad, slice after)
    if Cp != C:
        head_w = jnp.pad(head_w, ((0, 0), (0, Cp - C)))
        head_b = jnp.pad(head_b, ((0, 0), (0, Cp - C)))
    fixed = [norm_w, norm_b, head_w.astype(jnp.bfloat16), head_b]

    def layer_spec(w):
        s = w.shape                        # (L, ...)
        blk = (1,) + s[1:]
        nrest = len(s) - 1
        return pl.BlockSpec(blk, lambda b, l, _n=nrest: (l,) + (0,) * _n)

    def fixed_spec(w):
        s = w.shape
        return pl.BlockSpec(s, lambda b, l, _n=len(s): (0,) * _n)

    in_specs = ([pl.BlockSpec((1, N, D), lambda b, l: (b, 0, 0))]
                + [layer_spec(w) for w in stacked]
                + [fixed_spec(w) for w in fixed])

    out = pl.pallas_call(
        partial(decoder_kernel, num_heads),
        out_shape=jax.ShapeDtypeStruct((B, N, Cp), x.dtype),
        grid_spec=pltpu.PrefetchScalarGridSpec(
            num_scalar_prefetch=0,
            grid=(B, L),
            in_specs=in_specs,
            out_specs=pl.BlockSpec((1, N, Cp), lambda b, l: (b, 0, 0)),
            scratch_shapes=[pltpu.VMEM((N, D), jnp.float32)],
        ),
        compiler_params=pltpu.CompilerParams(
            dimension_semantics=("parallel", "arbitrary"),
            # modest explicit budget; raise toward 128 MiB on v5e/v6e (keep <=~48 MiB on v7x)
            # for large D to allow deeper weight buffering.
            vmem_limit_bytes=32 * 1024 * 1024,
        ),
    )(x, *stacked, *fixed)

    return out[..., :C]


# ------------------------------- parameter init -------------------------------

def _xavier(key, fan_in, fan_out):
    # returns weight already transposed to [in, out] (PyTorch stores [out, in])
    limit = math.sqrt(6.0 / (fan_in + fan_out))
    return jax.random.uniform(key, (fan_in, fan_out), jnp.float32, -limit, limit)


def init_params(key, embed_dim, depth, num_classes, mlp_ratio):
    D = embed_dim
    Hid = int(D * mlp_ratio)
    blocks = []
    for _ in range(depth):
        key, k1, k2, k3, k4 = jax.random.split(key, 5)
        blocks.append(dict(
            ln1_w=jnp.ones((1, D), jnp.float32), ln1_b=jnp.zeros((1, D), jnp.float32),
            qkv_w=_xavier(k1, D, 3 * D),         qkv_b=jnp.zeros((1, 3 * D), jnp.float32),
            proj_w=_xavier(k2, D, D),            proj_b=jnp.zeros((1, D), jnp.float32),
            ln2_w=jnp.ones((1, D), jnp.float32), ln2_b=jnp.zeros((1, D), jnp.float32),
            fc1_w=_xavier(k3, D, Hid),           fc1_b=jnp.zeros((1, Hid), jnp.float32),
            fc2_w=_xavier(k4, Hid, D),           fc2_b=jnp.zeros((1, D), jnp.float32),
        ))
    key, kh = jax.random.split(key)
    return dict(
        blocks=blocks,
        norm_w=jnp.ones((1, D), jnp.float32), norm_b=jnp.zeros((1, D), jnp.float32),
        head_w=_xavier(kh, D, num_classes),   head_b=jnp.zeros((1, num_classes), jnp.float32),
    )


# ------------------------------- main -------------------------------

if __name__ == "__main__":
    # small MAE decoder config (eval mode: dropout / drop_path are identity)
    B, N = 2, 8            # batch, tokens
    D, H = 32, 4           # embed_dim, num_heads
    DEPTH = 2
    MLP_RATIO = 4.0
    NUM_CLASSES = 48       # decoder head output dim (patch_size**3 * chans in the real model)

    key = jax.random.PRNGKey(0)
    kx, kp = jax.random.split(key)
    x = jax.random.normal(kx, (B, N, D), jnp.float32)
    params = init_params(kp, D, DEPTH, NUM_CLASSES, MLP_RATIO)

    y = mae_vit_decoder_forward(x, params, num_heads=H)
    y = jax.block_until_ready(y)
    assert y.shape == (B, N, NUM_CLASSES)
    print("KERNEL_OK")
</pallas_src>

<mosaic_0001>
module attributes {stable_mosaic.version = 11 : i64} {
  func.func @decoder_kernel(%arg0: i32, %arg1: i32, %arg2: memref<1x8x32xf32, #tpu.memory_space<vmem>>, %arg3: memref<1x1x32xf32, #tpu.memory_space<vmem>>, %arg4: memref<1x1x32xf32, #tpu.memory_space<vmem>>, %arg5: memref<1x32x96xbf16, #tpu.memory_space<vmem>>, %arg6: memref<1x1x96xf32, #tpu.memory_space<vmem>>, %arg7: memref<1x32x32xbf16, #tpu.memory_space<vmem>>, %arg8: memref<1x1x32xf32, #tpu.memory_space<vmem>>, %arg9: memref<1x1x32xf32, #tpu.memory_space<vmem>>, %arg10: memref<1x1x32xf32, #tpu.memory_space<vmem>>, %arg11: memref<1x32x128xbf16, #tpu.memory_space<vmem>>, %arg12: memref<1x1x128xf32, #tpu.memory_space<vmem>>, %arg13: memref<1x128x32xbf16, #tpu.memory_space<vmem>>, %arg14: memref<1x1x32xf32, #tpu.memory_space<vmem>>, %arg15: memref<1x32xf32, #tpu.memory_space<vmem>>, %arg16: memref<1x32xf32, #tpu.memory_space<vmem>>, %arg17: memref<32x128xbf16, #tpu.memory_space<vmem>>, %arg18: memref<1x128xf32, #tpu.memory_space<vmem>>, %arg19: memref<1x8x128xf32, #tpu.memory_space<vmem>>, %arg20: memref<8x32xf32, #tpu.memory_space<vmem>>) attributes {dimension_semantics = [#tpu.dimension_semantics<parallel>, #tpu.dimension_semantics<arbitrary>], iteration_bounds = array<i64: 2, 2>, scalar_prefetch = 0 : i64, scratch_operands = 1 : i64, tpu.core_type = #tpu.core_type<tc>, window_params = [{transform_indices = @transform_0, window_bounds = array<i64: 1, 8, 32>}, {transform_indices = @transform_1, window_bounds = array<i64: 1, 1, 32>}, {transform_indices = @transform_2, window_bounds = array<i64: 1, 1, 32>}, {transform_indices = @transform_3, window_bounds = array<i64: 1, 32, 96>}, {transform_indices = @transform_4, window_bounds = array<i64: 1, 1, 96>}, {transform_indices = @transform_5, window_bounds = array<i64: 1, 32, 32>}, {transform_indices = @transform_6, window_bounds = array<i64: 1, 1, 32>}, {transform_indices = @transform_7, window_bounds = array<i64: 1, 1, 32>}, {transform_indices = @transform_8, window_bounds = array<i64: 1, 1, 32>}, {transform_indices = @transform_9, window_bounds = array<i64: 1, 32, 128>}, {transform_indices = @transform_10, window_bounds = array<i64: 1, 1, 128>}, {transform_indices = @transform_11, window_bounds = array<i64: 1, 128, 32>}, {transform_indices = @transform_12, window_bounds = array<i64: 1, 1, 32>}, {pipeline_mode = #tpu.pipeline_mode<synchronous>, transform_indices = @transform_13, window_bounds = array<i64: 1, 32>}, {pipeline_mode = #tpu.pipeline_mode<synchronous>, transform_indices = @transform_14, window_bounds = array<i64: 1, 32>}, {pipeline_mode = #tpu.pipeline_mode<synchronous>, transform_indices = @transform_15, window_bounds = array<i64: 32, 128>}, {pipeline_mode = #tpu.pipeline_mode<synchronous>, transform_indices = @transform_16, window_bounds = array<i64: 1, 128>}, {transform_indices = @transform_17, window_bounds = array<i64: 1, 8, 128>}]} {
    %c0_i32 = arith.constant 0 : i32
    %0 = arith.cmpi eq, %arg1, %c0_i32 : i32
    %1 = arith.extui %0 : i1 to i32
    %c0_i32_0 = arith.constant 0 : i32
    %2 = arith.cmpi ne, %1, %c0_i32_0 : i32
    scf.if %2 {
      %c0_77 = arith.constant 0 : index
      %c0_78 = arith.constant 0 : index
      %c0_79 = arith.constant 0 : index
      %183 = vector.load %arg2[%c0_77, %c0_78, %c0_79] : memref<1x8x32xf32, #tpu.memory_space<vmem>>, vector<1x8x32xf32>
      %184 = vector.shape_cast %183 : vector<1x8x32xf32> to vector<8x32xf32>
      %c0_80 = arith.constant 0 : index
      %c0_81 = arith.constant 0 : index
      %185 = vector.load %arg20[%c0_80, %c0_81] : memref<8x32xf32, #tpu.memory_space<vmem>>, vector<8x32xf32>
      tpu.vector_store %arg20[%c0_80, %c0_81], %184 {strides = array<i32>} : memref<8x32xf32, #tpu.memory_space<vmem>>, vector<8x32xf32>,
    } else {
    }
    %c0 = arith.constant 0 : index
    %c0_1 = arith.constant 0 : index
    %3 = vector.load %arg20[%c0, %c0_1] : memref<8x32xf32, #tpu.memory_space<vmem>>, vector<8x32xf32>
    %c0_2 = arith.constant 0 : index
    %c0_3 = arith.constant 0 : index
    %c0_4 = arith.constant 0 : index
    %4 = vector.load %arg3[%c0_2, %c0_3, %c0_4] : memref<1x1x32xf32, #tpu.memory_space<vmem>>, vector<1x1x32xf32>
    %5 = vector.shape_cast %4 : vector<1x1x32xf32> to vector<1x32xf32>
    %c0_5 = arith.constant 0 : index
    %c0_6 = arith.constant 0 : index
    %c0_7 = arith.constant 0 : index
    %6 = vector.load %arg4[%c0_5, %c0_6, %c0_7] : memref<1x1x32xf32, #tpu.memory_space<vmem>>, vector<1x1x32xf32>
    %7 = vector.shape_cast %6 : vector<1x1x32xf32> to vector<1x32xf32>
    %c0_8 = arith.constant 0 : index
    %c0_9 = arith.constant 0 : index
    %c0_10 = arith.constant 0 : index
    %8 = vector.load %arg5[%c0_8, %c0_9, %c0_10] : memref<1x32x96xbf16, #tpu.memory_space<vmem>>, vector<1x32x96xbf16>
    %9 = vector.shape_cast %8 : vector<1x32x96xbf16> to vector<32x96xbf16>
    %c0_11 = arith.constant 0 : index
    %c0_12 = arith.constant 0 : index
    %c0_13 = arith.constant 0 : index
    %10 = vector.load %arg6[%c0_11, %c0_12, %c0_13] : memref<1x1x96xf32, #tpu.memory_space<vmem>>, vector<1x1x96xf32>
    %11 = vector.shape_cast %10 : vector<1x1x96xf32> to vector<1x96xf32>
    %c0_14 = arith.constant 0 : index
    %c0_15 = arith.constant 0 : index
    %c0_16 = arith.constant 0 : index
    %12 = vector.load %arg7[%c0_14, %c0_15, %c0_16] : memref<1x32x32xbf16, #tpu.memory_space<vmem>>, vector<1x32x32xbf16>
    %13 = vector.shape_cast %12 : vector<1x32x32xbf16> to vector<32x32xbf16>
    %c0_17 = arith.constant 0 : index
    %c0_18 = arith.constant 0 : index
    %c0_19 = arith.constant 0 : index
    %14 = vector.load %arg8[%c0_17, %c0_18, %c0_19] : memref<1x1x32xf32, #tpu.memory_space<vmem>>, vector<1x1x32xf32>
    %15 = vector.shape_cast %14 : vector<1x1x32xf32> to vector<1x32xf32>
    %c0_20 = arith.constant 0 : index
    %c0_21 = arith.constant 0 : index
    %c0_22 = arith.constant 0 : index
    %16 = vector.load %arg9[%c0_20, %c0_21, %c0_22] : memref<1x1x32xf32, #tpu.memory_space<vmem>>, vector<1x1x32xf32>
    %17 = vector.shape_cast %16 : vector<1x1x32xf32> to vector<1x32xf32>
    %c0_23 = arith.constant 0 : index
    %c0_24 = arith.constant 0 : index
    %c0_25 = arith.constant 0 : index
    %18 = vector.load %arg10[%c0_23, %c0_24, %c0_25] : memref<1x1x32xf32, #tpu.memory_space<vmem>>, vector<1x1x32xf32>
    %19 = vector.shape_cast %18 : vector<1x1x32xf32> to vector<1x32xf32>
    %c0_26 = arith.constant 0 : index
    %c0_27 = arith.constant 0 : index
    %c0_28 = arith.constant 0 : index
    %20 = vector.load %arg11[%c0_26, %c0_27, %c0_28] : memref<1x32x128xbf16, #tpu.memory_space<vmem>>, vector<1x32x128xbf16>
    %21 = vector.shape_cast %20 : vector<1x32x128xbf16> to vector<32x128xbf16>
    %c0_29 = arith.constant 0 : index
    %c0_30 = arith.constant 0 : index
    %c0_31 = arith.constant 0 : index
    %22 = vector.load %arg12[%c0_29, %c0_30, %c0_31] : memref<1x1x128xf32, #tpu.memory_space<vmem>>, vector<1x1x128xf32>
    %23 = vector.shape_cast %22 : vector<1x1x128xf32> to vector<1x128xf32>
    %c0_32 = arith.constant 0 : index
    %c0_33 = arith.constant 0 : index
    %c0_34 = arith.constant 0 : index
    %24 = vector.load %arg13[%c0_32, %c0_33, %c0_34] : memref<1x128x32xbf16, #tpu.memory_space<vmem>>, vector<1x128x32xbf16>
    %25 = vector.shape_cast %24 : vector<1x128x32xbf16> to vector<128x32xbf16>
    %c0_35 = arith.constant 0 : index
    %c0_36 = arith.constant 0 : index
    %c0_37 = arith.constant 0 : index
    %26 = vector.load %arg14[%c0_35, %c0_36, %c0_37] : memref<1x1x32xf32, #tpu.memory_space<vmem>>, vector<1x1x32xf32>
    %27 = vector.shape_cast %26 : vector<1x1x32xf32> to vector<1x32xf32>
    %cst = arith.constant dense<0.000000e+00> : vector<8xf32>
    %28 = vector.multi_reduction <add>, %3, %cst [1] : vector<8x32xf32> to vector<8xf32>
    %29 = vector.shape_cast %28 : vector<8xf32> to vector<8x1xf32>
    %cst_38 = arith.constant 3.200000e+01 : f32
    %30 = vector.broadcast %cst_38 : f32 to vector<8x1xf32>
    %31 = arith.divf %29, %30 : vector<8x1xf32>
    %32 = vector.broadcast %31 : vector<8x1xf32> to vector<8x32xf32>
    %33 = arith.subf %3, %32 : vector<8x32xf32>
    %34 = arith.mulf %33, %33 : vector<8x32xf32>
    %cst_39 = arith.constant dense<0.000000e+00> : vector<8xf32>
    %35 = vector.multi_reduction <add>, %34, %cst_39 [1] : vector<8x32xf32> to vector<8xf32>
    %36 = vector.shape_cast %35 : vector<8xf32> to vector<8x1xf32>
    %cst_40 = arith.constant 3.200000e+01 : f32
    %37 = vector.broadcast %cst_40 : f32 to vector<8x1xf32>
    %38 = arith.divf %36, %37 : vector<8x1xf32>
    %cst_41 = arith.constant 9.99999997E-7 : f32
    %39 = vector.broadcast %cst_41 : f32 to vector<8x1xf32>
    %40 = arith.addf %38, %39 : vector<8x1xf32>
    %41 = math.rsqrt %40 : vector<8x1xf32>
    %42 = vector.broadcast %41 : vector<8x1xf32> to vector<8x32xf32>
    %43 = arith.mulf %33, %42 : vector<8x32xf32>
    %44 = vector.broadcast %5 : vector<1x32xf32> to vector<8x32xf32>
    %45 = arith.mulf %43, %44 : vector<8x32xf32>
    %46 = vector.broadcast %7 : vector<1x32xf32> to vector<8x32xf32>
    %47 = arith.addf %45, %46 : vector<8x32xf32>
    %48 = arith.truncf %47 : vector<8x32xf32> to vector<8x32xbf16>
    %cst_42 = arith.constant dense<0.000000e+00> : vector<8x96xf32>
    %49 = tpu.matmul %48, %9, %cst_42 {dimension_numbers = #tpu.dot_dimension_numbers<[1], [0], [0], [1], [0, 0, 1, 1], [], []>} : vector<8x32xbf16>, vector<32x96xbf16>, vector<8x96xf32> -> vector<8x96xf32>
    %50 = vector.broadcast %11 : vector<1x96xf32> to vector<8x96xf32>
    %51 = arith.addf %49, %50 : vector<8x96xf32>
    %52 = vector.extract_strided_slice %51 {offsets = [0, 0], sizes = [8, 8], strides = [1, 1]} : vector<8x96xf32> to vector<8x8xf32>
    %cst_43 = arith.constant 0.353553385 : f32
    %53 = vector.broadcast %cst_43 : f32 to vector<8x8xf32>
    %54 = arith.mulf %52, %53 : vector<8x8xf32>
    %55 = arith.truncf %54 : vector<8x8xf32> to vector<8x8xbf16>
    %56 = vector.extract_strided_slice %51 {offsets = [0, 32], sizes = [8, 8], strides = [1, 1]} : vector<8x96xf32> to vector<8x8xf32>
    %57 = arith.truncf %56 : vector<8x8xf32> to vector<8x8xbf16>
    %58 = vector.extract_strided_slice %51 {offsets = [0, 64], sizes = [8, 8], strides = [1, 1]} : vector<8x96xf32> to vector<8x8xf32>
    %59 = arith.truncf %58 : vector<8x8xf32> to vector<8x8xbf16>
    %cst_44 = arith.constant dense<0.000000e+00> : vector<8x8xf32>
    %60 = tpu.matmul %55, %57, %cst_44 {dimension_numbers = #tpu.dot_dimension_numbers<[1], [1], [0], [0], [0, 0, 1, 0], [], []>} : vector<8x8xbf16>, vector<8x8xbf16>, vector<8x8xf32> -> vector<8x8xf32>
    %cst_45 = arith.constant dense<0xFF800000> : vector<8xf32>
    %61 = vector.multi_reduction <maximumf>, %60, %cst_45 [1] : vector<8x8xf32> to vector<8xf32>
    %62 = vector.shape_cast %61 : vector<8xf32> to vector<8x1xf32>
    %63 = vector.broadcast %62 : vector<8x1xf32> to vector<8x8xf32>
    %64 = arith.subf %60, %63 : vector<8x8xf32>
    %65 = math.exp %64 : vector<8x8xf32>
    %cst_46 = arith.constant dense<0.000000e+00> : vector<8xf32>
    %66 = vector.multi_reduction <add>, %65, %cst_46 [1] : vector<8x8xf32> to vector<8xf32>
    %67 = vector.shape_cast %66 : vector<8xf32> to vector<8x1xf32>
    %68 = tpu.reciprocal %67 {approx = true} : vector<8x1xf32> -> vector<8x1xf32>
    %69 = vector.broadcast %68 : vector<8x1xf32> to vector<8x8xf32>
    %70 = arith.mulf %65, %69 : vector<8x8xf32>
    %71 = arith.truncf %70 : vector<8x8xf32> to vector<8x8xbf16>
    %cst_47 = arith.constant dense<0.000000e+00> : vector<8x8xf32>
    %72 = tpu.matmul %71, %59, %cst_47 {dimension_numbers = #tpu.dot_dimension_numbers<[1], [0], [0], [1], [0, 0, 1, 1], [], []>} : vector<8x8xbf16>, vector<8x8xbf16>, vector<8x8xf32> -> vector<8x8xf32>
    %73 = vector.extract_strided_slice %51 {offsets = [0, 8], sizes = [8, 8], strides = [1, 1]} : vector<8x96xf32> to vector<8x8xf32>
    %cst_48 = arith.constant 0.353553385 : f32
    %74 = vector.broadcast %cst_48 : f32 to vector<8x8xf32>
    %75 = arith.mulf %73, %74 : vector<8x8xf32>
    %76 = arith.truncf %75 : vector<8x8xf32> to vector<8x8xbf16>
    %77 = vector.extract_strided_slice %51 {offsets = [0, 40], sizes = [8, 8], strides = [1, 1]} : vector<8x96xf32> to vector<8x8xf32>
    %78 = arith.truncf %77 : vector<8x8xf32> to vector<8x8xbf16>
    %79 = vector.extract_strided_slice %51 {offsets = [0, 72], sizes = [8, 8], strides = [1, 1]} : vector<8x96xf32> to vector<8x8xf32>
    %80 = arith.truncf %79 : vector<8x8xf32> to vector<8x8xbf16>
    %cst_49 = arith.constant dense<0.000000e+00> : vector<8x8xf32>
    %81 = tpu.matmul %76, %78, %cst_49 {dimension_numbers = #tpu.dot_dimension_numbers<[1], [1], [0], [0], [0, 0, 1, 0], [], []>} : vector<8x8xbf16>, vector<8x8xbf16>, vector<8x8xf32> -> vector<8x8xf32>
    %cst_50 = arith.constant dense<0xFF800000> : vector<8xf32>
    %82 = vector.multi_reduction <maximumf>, %81, %cst_50 [1] : vector<8x8xf32> to vector<8xf32>
    %83 = vector.shape_cast %82 : vector<8xf32> to vector<8x1xf32>
    %84 = vector.broadcast %83 : vector<8x1xf32> to vector<8x8xf32>
    %85 = arith.subf %81, %84 : vector<8x8xf32>
    %86 = math.exp %85 : vector<8x8xf32>
    %cst_51 = arith.constant dense<0.000000e+00> : vector<8xf32>
    %87 = vector.multi_reduction <add>, %86, %cst_51 [1] : vector<8x8xf32> to vector<8xf32>
    %88 = vector.shape_cast %87 : vector<8xf32> to vector<8x1xf32>
    %89 = tpu.reciprocal %88 {approx = true} : vector<8x1xf32> -> vector<8x1xf32>
    %90 = vector.broadcast %89 : vector<8x1xf32> to vector<8x8xf32>
    %91 = arith.mulf %86, %90 : vector<8x8xf32>
    %92 = arith.truncf %91 : vector<8x8xf32> to vector<8x8xbf16>
    %cst_52 = arith.constant dense<0.000000e+00> : vector<8x8xf32>
    %93 = tpu.matmul %92, %80, %cst_52 {dimension_numbers = #tpu.dot_dimension_numbers<[1], [0], [0], [1], [0, 0, 1, 1], [], []>} : vector<8x8xbf16>, vector<8x8xbf16>, vector<8x8xf32> -> vector<8x8xf32>
    %94 = vector.extract_strided_slice %51 {offsets = [0, 16], sizes = [8, 8], strides = [1, 1]} : vector<8x96xf32> to vector<8x8xf32>
    %cst_53 = arith.constant 0.353553385 : f32
    %95 = vector.broadcast %cst_53 : f32 to vector<8x8xf32>
    %96 = arith.mulf %94, %95 : vector<8x8xf32>
    %97 = arith.truncf %96 : vector<8x8xf32> to vector<8x8xbf16>
    %98 = vector.extract_strided_slice %51 {offsets = [0, 48], sizes = [8, 8], strides = [1, 1]} : vector<8x96xf32> to vector<8x8xf32>
    %99 = arith.truncf %98 : vector<8x8xf32> to vector<8x8xbf16>
    %100 = vector.extract_strided_slice %51 {offsets = [0, 80], sizes = [8, 8], strides = [1, 1]} : vector<8x96xf32> to vector<8x8xf32>
    %101 = arith.truncf %100 : vector<8x8xf32> to vector<8x8xbf16>
    %cst_54 = arith.constant dense<0.000000e+00> : vector<8x8xf32>
    %102 = tpu.matmul %97, %99, %cst_54 {dimension_numbers = #tpu.dot_dimension_numbers<[1], [1], [0], [0], [0, 0, 1, 0], [], []>} : vector<8x8xbf16>, vector<8x8xbf16>, vector<8x8xf32> -> vector<8x8xf32>
    %cst_55 = arith.constant dense<0xFF800000> : vector<8xf32>
    %103 = vector.multi_reduction <maximumf>, %102, %cst_55 [1] : vector<8x8xf32> to vector<8xf32>
    %104 = vector.shape_cast %103 : vector<8xf32> to vector<8x1xf32>
    %105 = vector.broadcast %104 : vector<8x1xf32> to vector<8x8xf32>
    %106 = arith.subf %102, %105 : vector<8x8xf32>
    %107 = math.exp %106 : vector<8x8xf32>
    %cst_56 = arith.constant dense<0.000000e+00> : vector<8xf32>
    %108 = vector.multi_reduction <add>, %107, %cst_56 [1] : vector<8x8xf32> to vector<8xf32>
    %109 = vector.shape_cast %108 : vector<8xf32> to vector<8x1xf32>
    %110 = tpu.reciprocal %109 {approx = true} : vector<8x1xf32> -> vector<8x1xf32>
    %111 = vector.broadcast %110 : vector<8x1xf32> to vector<8x8xf32>
    %112 = arith.mulf %107, %111 : vector<8x8xf32>
    %113 = arith.truncf %112 : vector<8x8xf32> to vector<8x8xbf16>
    %cst_57 = arith.constant dense<0.000000e+00> : vector<8x8xf32>
    %114 = tpu.matmul %113, %101, %cst_57 {dimension_numbers = #tpu.dot_dimension_numbers<[1], [0], [0], [1], [0, 0, 1, 1], [], []>} : vector<8x8xbf16>, vector<8x8xbf16>, vector<8x8xf32> -> vector<8x8xf32>
    %115 = vector.extract_strided_slice %51 {offsets = [0, 24], sizes = [8, 8], strides = [1, 1]} : vector<8x96xf32> to vector<8x8xf32>
    %cst_58 = arith.constant 0.353553385 : f32
    %116 = vector.broadcast %cst_58 : f32 to vector<8x8xf32>
    %117 = arith.mulf %115, %116 : vector<8x8xf32>
    %118 = arith.truncf %117 : vector<8x8xf32> to vector<8x8xbf16>
    %119 = vector.extract_strided_slice %51 {offsets = [0, 56], sizes = [8, 8], strides = [1, 1]} : vector<8x96xf32> to vector<8x8xf32>
    %120 = arith.truncf %119 : vector<8x8xf32> to vector<8x8xbf16>
    %121 = vector.extract_strided_slice %51 {offsets = [0, 88], sizes = [8, 8], strides = [1, 1]} : vector<8x96xf32> to vector<8x8xf32>
    %122 = arith.truncf %121 : vector<8x8xf32> to vector<8x8xbf16>
    %cst_59 = arith.constant dense<0.000000e+00> : vector<8x8xf32>
    %123 = tpu.matmul %118, %120, %cst_59 {dimension_numbers = #tpu.dot_dimension_numbers<[1], [1], [0], [0], [0, 0, 1, 0], [], []>} : vector<8x8xbf16>, vector<8x8xbf16>, vector<8x8xf32> -> vector<8x8xf32>
    %cst_60 = arith.constant dense<0xFF800000> : vector<8xf32>
    %124 = vector.multi_reduction <maximumf>, %123, %cst_60 [1] : vector<8x8xf32> to vector<8xf32>
    %125 = vector.shape_cast %124 : vector<8xf32> to vector<8x1xf32>
    %126 = vector.broadcast %125 : vector<8x1xf32> to vector<8x8xf32>
    %127 = arith.subf %123, %126 : vector<8x8xf32>
    %128 = math.exp %127 : vector<8x8xf32>
    %cst_61 = arith.constant dense<0.000000e+00> : vector<8xf32>
    %129 = vector.multi_reduction <add>, %128, %cst_61 [1] : vector<8x8xf32> to vector<8xf32>
    %130 = vector.shape_cast %129 : vector<8xf32> to vector<8x1xf32>
    %131 = tpu.reciprocal %130 {approx = true} : vector<8x1xf32> -> vector<8x1xf32>
    %132 = vector.broadcast %131 : vector<8x1xf32> to vector<8x8xf32>
    %133 = arith.mulf %128, %132 : vector<8x8xf32>
    %134 = arith.truncf %133 : vector<8x8xf32> to vector<8x8xbf16>
    %cst_62 = arith.constant dense<0.000000e+00> : vector<8x8xf32>
    %135 = tpu.matmul %134, %122, %cst_62 {dimension_numbers = #tpu.dot_dimension_numbers<[1], [0], [0], [1], [0, 0, 1, 1], [], []>} : vector<8x8xbf16>, vector<8x8xbf16>, vector<8x8xf32> -> vector<8x8xf32>
    %136 = tpu.concatenate %72, %93, %114, %135 in 1 : vector<8x8xf32>, vector<8x8xf32>, vector<8x8xf32>, vector<8x8xf32> -> vector<8x32xf32>
    %137 = arith.truncf %136 : vector<8x32xf32> to vector<8x32xbf16>
    %cst_63 = arith.constant dense<0.000000e+00> : vector<8x32xf32>
    %138 = tpu.matmul %137, %13, %cst_63 {dimension_numbers = #tpu.dot_dimension_numbers<[1], [0], [0], [1], [0, 0, 1, 1], [], []>} : vector<8x32xbf16>, vector<32x32xbf16>, vector<8x32xf32> -> vector<8x32xf32>
    %139 = arith.addf %3, %138 : vector<8x32xf32>
    %140 = vector.broadcast %15 : vector<1x32xf32> to vector<8x32xf32>
    %141 = arith.addf %139, %140 : vector<8x32xf32>
    %cst_64 = arith.constant dense<0.000000e+00> : vector<8xf32>
    %142 = vector.multi_reduction <add>, %141, %cst_64 [1] : vector<8x32xf32> to vector<8xf32>
    %143 = vector.shape_cast %142 : vector<8xf32> to vector<8x1xf32>
    %cst_65 = arith.constant 3.200000e+01 : f32
    %144 = vector.broadcast %cst_65 : f32 to vector<8x1xf32>
    %145 = arith.divf %143, %144 : vector<8x1xf32>
    %146 = vector.broadcast %145 : vector<8x1xf32> to vector<8x32xf32>
    %147 = arith.subf %141, %146 : vector<8x32xf32>
    %148 = arith.mulf %147, %147 : vector<8x32xf32>
    %cst_66 = arith.constant dense<0.000000e+00> : vector<8xf32>
    %149 = vector.multi_reduction <add>, %148, %cst_66 [1] : vector<8x32xf32> to vector<8xf32>
    %150 = vector.shape_cast %149 : vector<8xf32> to vector<8x1xf32>
    %cst_67 = arith.constant 3.200000e+01 : f32
    %151 = vector.broadcast %cst_67 : f32 to vector<8x1xf32>
    %152 = arith.divf %150, %151 : vector<8x1xf32>
    %cst_68 = arith.constant 9.99999997E-7 : f32
    %153 = vector.broadcast %cst_68 : f32 to vector<8x1xf32>
    %154 = arith.addf %152, %153 : vector<8x1xf32>
    %155 = math.rsqrt %154 : vector<8x1xf32>
    %156 = vector.broadcast %155 : vector<8x1xf32> to vector<8x32xf32>
    %157 = arith.mulf %147, %156 : vector<8x32xf32>
    %158 = vector.broadcast %17 : vector<1x32xf32> to vector<8x32xf32>
    %159 = arith.mulf %157, %158 : vector<8x32xf32>
    %160 = vector.broadcast %19 : vector<1x32xf32> to vector<8x32xf32>
    %161 = arith.addf %159, %160 : vector<8x32xf32>
    %162 = arith.truncf %161 : vector<8x32xf32> to vector<8x32xbf16>
    %cst_69 = arith.constant dense<0.000000e+00> : vector<8x128xf32>
    %163 = tpu.matmul %162, %21, %cst_69 {dimension_numbers = #tpu.dot_dimension_numbers<[1], [0], [0], [1], [0, 0, 1, 1], [], []>} : vector<8x32xbf16>, vector<32x128xbf16>, vector<8x128xf32> -> vector<8x128xf32>
    %164 = vector.broadcast %23 : vector<1x128xf32> to vector<8x128xf32>
    %165 = arith.addf %163, %164 : vector<8x128xf32>
    %cst_70 = arith.constant 5.000000e-01 : f32
    %166 = vector.broadcast %cst_70 : f32 to vector<8x128xf32>
    %167 = arith.mulf %166, %165 : vector<8x128xf32>
    %cst_71 = arith.constant 0.707106769 : f32
    %168 = vector.broadcast %cst_71 : f32 to vector<8x128xf32>
    %169 = arith.mulf %165, %168 : vector<8x128xf32>
    %170 = math.erf %169 : vector<8x128xf32>
    %cst_72 = arith.constant 1.000000e+00 : f32
    %171 = vector.broadcast %cst_72 : f32 to vector<8x128xf32>
    %172 = arith.addf %171, %170 : vector<8x128xf32>
    %173 = arith.mulf %167, %172 : vector<8x128xf32>
    %174 = arith.truncf %173 : vector<8x128xf32> to vector<8x128xbf16>
    %cst_73 = arith.constant dense<0.000000e+00> : vector<8x32xf32>
    %175 = tpu.matmul %174, %25, %cst_73 {dimension_numbers = #tpu.dot_dimension_numbers<[1], [0], [0], [1], [0, 0, 1, 1], [], []>} : vector<8x128xbf16>, vector<128x32xbf16>, vector<8x32xf32> -> vector<8x32xf32>
    %176 = arith.addf %141, %175 : vector<8x32xf32>
    %177 = vector.broadcast %27 : vector<1x32xf32> to vector<8x32xf32>
    %178 = arith.addf %176, %177 : vector<8x32xf32>
    %c0_74 = arith.constant 0 : index
    %c0_75 = arith.constant 0 : index
    %179 = vector.load %arg20[%c0_74, %c0_75] : memref<8x32xf32, #tpu.memory_space<vmem>>, vector<8x32xf32>
    tpu.vector_store %arg20[%c0_74, %c0_75], %178 {strides = array<i32>} : memref<8x32xf32, #tpu.memory_space<vmem>>, vector<8x32xf32>,
    %c1_i32 = arith.constant 1 : i32
    %180 = arith.cmpi eq, %arg1, %c1_i32 : i32
    %181 = arith.extui %180 : i1 to i32
    %c0_i32_76 = arith.constant 0 : i32
    %182 = arith.cmpi ne, %181, %c0_i32_76 : i32
    scf.if %182 {
      %c0_77 = arith.constant 0 : index
      %c0_78 = arith.constant 0 : index
      %183 = vector.load %arg15[%c0_77, %c0_78] : memref<1x32xf32, #tpu.memory_space<vmem>>, vector<1x32xf32>
      %c0_79 = arith.constant 0 : index
      %c0_80 = arith.constant 0 : index
      %184 = vector.load %arg16[%c0_79, %c0_80] : memref<1x32xf32, #tpu.memory_space<vmem>>, vector<1x32xf32>
      %cst_81 = arith.constant dense<0.000000e+00> : vector<8xf32>
      %185 = vector.multi_reduction <add>, %178, %cst_81 [1] : vector<8x32xf32> to vector<8xf32>
      %186 = vector.shape_cast %185 : vector<8xf32> to vector<8x1xf32>
      %cst_82 = arith.constant 3.200000e+01 : f32
      %187 = vector.broadcast %cst_82 : f32 to vector<8x1xf32>
      %188 = arith.divf %186, %187 : vector<8x1xf32>
      %189 = vector.broadcast %188 : vector<8x1xf32> to vector<8x32xf32>
      %190 = arith.subf %178, %189 : vector<8x32xf32>
      %191 = arith.mulf %190, %190 : vector<8x32xf32>
      %cst_83 = arith.constant dense<0.000000e+00> : vector<8xf32>
      %192 = vector.multi_reduction <add>, %191, %cst_83 [1] : vector<8x32xf32> to vector<8xf32>
      %193 = vector.shape_cast %192 : vector<8xf32> to vector<8x1xf32>
      %cst_84 = arith.constant 3.200000e+01 : f32
      %194 = vector.broadcast %cst_84 : f32 to vector<8x1xf32>
      %195 = arith.divf %193, %194 : vector<8x1xf32>
      %cst_85 = arith.constant 9.99999997E-7 : f32
      %196 = vector.broadcast %cst_85 : f32 to vector<8x1xf32>
      %197 = arith.addf %195, %196 : vector<8x1xf32>
      %198 = math.rsqrt %197 : vector<8x1xf32>
      %199 = vector.broadcast %198 : vector<8x1xf32> to vector<8x32xf32>
      %200 = arith.mulf %190, %199 : vector<8x32xf32>
      %201 = vector.broadcast %183 : vector<1x32xf32> to vector<8x32xf32>
      %202 = arith.mulf %200, %201 : vector<8x32xf32>
      %203 = vector.broadcast %184 : vector<1x32xf32> to vector<8x32xf32>
      %204 = arith.addf %202, %203 : vector<8x32xf32>
      %205 = arith.truncf %204 : vector<8x32xf32> to vector<8x32xbf16>
      %c0_86 = arith.constant 0 : index
      %c0_87 = arith.constant 0 : index
      %206 = vector.load %arg17[%c0_86, %c0_87] : memref<32x128xbf16, #tpu.memory_space<vmem>>, vector<32x128xbf16>
      %cst_88 = arith.constant dense<0.000000e+00> : vector<8x128xf32>
      %207 = tpu.matmul %205, %206, %cst_88 {dimension_numbers = #tpu.dot_dimension_numbers<[1], [0], [0], [1], [0, 0, 1, 1], [], []>} : vector<8x32xbf16>, vector<32x128xbf16>, vector<8x128xf32> -> vector<8x128xf32>
      %c0_89 = arith.constant 0 : index
      %c0_90 = arith.constant 0 : index
      %208 = vector.load %arg18[%c0_89, %c0_90] : memref<1x128xf32, #tpu.memory_space<vmem>>, vector<1x128xf32>
      %209 = vector.broadcast %208 : vector<1x128xf32> to vector<8x128xf32>
      %210 = arith.addf %207, %209 : vector<8x128xf32>
      %c0_91 = arith.constant 0 : index
      %c0_92 = arith.constant 0 : index
      %c0_93 = arith.constant 0 : index
      %211 = vector.load %arg19[%c0_91, %c0_92, %c0_93] : memref<1x8x128xf32, #tpu.memory_space<vmem>>, vector<1x8x128xf32>
      %212 = vector.shape_cast %211 : vector<1x8x128xf32> to vector<8x128xf32>
      %213 = vector.shape_cast %210 : vector<8x128xf32> to vector<1x8x128xf32>
      tpu.vector_store %arg19[%c0_91, %c0_92, %c0_93], %213 {strides = array<i32>} : memref<1x8x128xf32, #tpu.memory_space<vmem>>, vector<1x8x128xf32>,
    } else {
    }
    return
  }
  func.func @transform_0(%arg0: i32, %arg1: i32) -> (i32, i32, i32) {
    %c0_i32 = arith.constant 0 : i32
    %c0_i32_0 = arith.constant 0 : i32
    %c0_i32_1 = arith.constant 0 : i32
    return %arg0, %c0_i32, %c0_i32_0 : i32, i32, i32
  }
  func.func @transform_1(%arg0: i32, %arg1: i32) -> (i32, i32, i32) {
    %c0_i32 = arith.constant 0 : i32
    %c0_i32_0 = arith.constant 0 : i32
    %c0_i32_1 = arith.constant 0 : i32
    return %arg1, %c0_i32, %c0_i32_0 : i32, i32, i32
  }
  func.func @transform_2(%arg0: i32, %arg1: i32) -> (i32, i32, i32) {
    %c0_i32 = arith.constant 0 : i32
    %c0_i32_0 = arith.constant 0 : i32
    %c0_i32_1 = arith.constant 0 : i32
    return %arg1, %c0_i32, %c0_i32_0 : i32, i32, i32
  }
  func.func @transform_3(%arg0: i32, %arg1: i32) -> (i32, i32, i32) {
    %c0_i32 = arith.constant 0 : i32
    %c0_i32_0 = arith.constant 0 : i32
    %c0_i32_1 = arith.constant 0 : i32
    return %arg1, %c0_i32, %c0_i32_0 : i32, i32, i32
  }
  func.func @transform_4(%arg0: i32, %arg1: i32) -> (i32, i32, i32) {
    %c0_i32 = arith.constant 0 : i32
    %c0_i32_0 = arith.constant 0 : i32
    %c0_i32_1 = arith.constant 0 : i32
    return %arg1, %c0_i32, %c0_i32_0 : i32, i32, i32
  }
  func.func @transform_5(%arg0: i32, %arg1: i32) -> (i32, i32, i32) {
    %c0_i32 = arith.constant 0 : i32
    %c0_i32_0 = arith.constant 0 : i32
    %c0_i32_1 = arith.constant 0 : i32
    return %arg1, %c0_i32, %c0_i32_0 : i32, i32, i32
  }
  func.func @transform_6(%arg0: i32, %arg1: i32) -> (i32, i32, i32) {
    %c0_i32 = arith.constant 0 : i32
    %c0_i32_0 = arith.constant 0 : i32
    %c0_i32_1 = arith.constant 0 : i32
    return %arg1, %c0_i32, %c0_i32_0 : i32, i32, i32
  }
  func.func @transform_7(%arg0: i32, %arg1: i32) -> (i32, i32, i32) {
    %c0_i32 = arith.constant 0 : i32
    %c0_i32_0 = arith.constant 0 : i32
    %c0_i32_1 = arith.constant 0 : i32
    return %arg1, %c0_i32, %c0_i32_0 : i32, i32, i32
  }
  func.func @transform_8(%arg0: i32, %arg1: i32) -> (i32, i32, i32) {
    %c0_i32 = arith.constant 0 : i32
    %c0_i32_0 = arith.constant 0 : i32
    %c0_i32_1 = arith.constant 0 : i32
    return %arg1, %c0_i32, %c0_i32_0 : i32, i32, i32
  }
  func.func @transform_9(%arg0: i32, %arg1: i32) -> (i32, i32, i32) {
    %c0_i32 = arith.constant 0 : i32
    %c0_i32_0 = arith.constant 0 : i32
    %c0_i32_1 = arith.constant 0 : i32
    return %arg1, %c0_i32, %c0_i32_0 : i32, i32, i32
  }
  func.func @transform_10(%arg0: i32, %arg1: i32) -> (i32, i32, i32) {
    %c0_i32 = arith.constant 0 : i32
    %c0_i32_0 = arith.constant 0 : i32
    %c0_i32_1 = arith.constant 0 : i32
    return %arg1, %c0_i32, %c0_i32_0 : i32, i32, i32
  }
  func.func @transform_11(%arg0: i32, %arg1: i32) -> (i32, i32, i32) {
    %c0_i32 = arith.constant 0 : i32
    %c0_i32_0 = arith.constant 0 : i32
    %c0_i32_1 = arith.constant 0 : i32
    return %arg1, %c0_i32, %c0_i32_0 : i32, i32, i32
  }
  func.func @transform_12(%arg0: i32, %arg1: i32) -> (i32, i32, i32) {
    %c0_i32 = arith.constant 0 : i32
    %c0_i32_0 = arith.constant 0 : i32
    %c0_i32_1 = arith.constant 0 : i32
    return %arg1, %c0_i32, %c0_i32_0 : i32, i32, i32
  }
  func.func @transform_13(%arg0: i32, %arg1: i32) -> (i32, i32) {
    %c0_i32 = arith.constant 0 : i32
    %c0_i32_0 = arith.constant 0 : i32
    %c0_i32_1 = arith.constant 0 : i32
    return %c0_i32, %c0_i32_0 : i32, i32
  }
  func.func @transform_14(%arg0: i32, %arg1: i32) -> (i32, i32) {
    %c0_i32 = arith.constant 0 : i32
    %c0_i32_0 = arith.constant 0 : i32
    %c0_i32_1 = arith.constant 0 : i32
    return %c0_i32, %c0_i32_0 : i32, i32
  }
  func.func @transform_15(%arg0: i32, %arg1: i32) -> (i32, i32) {
    %c0_i32 = arith.constant 0 : i32
    %c0_i32_0 = arith.constant 0 : i32
    %c0_i32_1 = arith.constant 0 : i32
    return %c0_i32, %c0_i32_0 : i32, i32
  }
  func.func @transform_16(%arg0: i32, %arg1: i32) -> (i32, i32) {
    %c0_i32 = arith.constant 0 : i32
    %c0_i32_0 = arith.constant 0 : i32
    %c0_i32_1 = arith.constant 0 : i32
    return %c0_i32, %c0_i32_0 : i32, i32
  }
  func.func @transform_17(%arg0: i32, %arg1: i32) -> (i32, i32, i32) {
    %c0_i32 = arith.constant 0 : i32
    %c0_i32_0 = arith.constant 0 : i32
    %c0_i32_1 = arith.constant 0 : i32
    return %arg0, %c0_i32, %c0_i32_0 : i32, i32, i32
  }
}

</mosaic_0001>

<bundles_post_ra>
// kernel: tpu_custom_call.1
= control target key start
LH: loop header
LB: loop body
LE: loop exit
PB: predicated region body
PF: predicated region fallthrough
CT: control target
= control target key end

     0   :  { %s2801_s0 = inlined_call_operand.vmem [shape: f32[2,8,32], index: 0, kind: input, shape index: {}]   ;;  %s2802_s1 = inlined_call_operand.vmem [shape: f32[2,1,32], index: 1, kind: input, shape index: {}]   ;;  %s2803_s2 = inlined_call_operand.vmem [shape: f32[2,1,32], index: 2, kind: input, shape index: {}]   ;;  %s2804_s3 = inlined_call_operand.vmem [shape: bf16[2,32,96], index: 3, kind: input, shape index: {}]   ;;  %s2805_s4 = inlined_call_operand.vmem [shape: f32[2,1,96], index: 4, kind: input, shape index: {}]   ;;  %s2806_s5 = inlined_call_operand.vmem [shape: bf16[2,32,32], index: 5, kind: input, shape index: {}]   ;;  %s2807_s6 = inlined_call_operand.vmem [shape: f32[2,1,32], index: 6, kind: input, shape index: {}]   ;;  %s2808_s7 = inlined_call_operand.vmem [shape: f32[2,1,32], index: 7, kind: input, shape index: {}]   ;;  %s2809_s8 = inlined_call_operand.vmem [shape: f32[2,1,32], index: 8, kind: input, shape index: {}]   ;;  %s2810_s9 = inlined_call_operand.vmem [shape: bf16[2,32,128], index: 9, kind: input, shape index: {}]   ;;  %s2811_s10 = inlined_call_operand.vmem [shape: f32[2,1,128], index: 10, kind: input, shape index: {}]   ;;  %s2812_s11 = inlined_call_operand.vmem [shape: bf16[2,128,32], index: 11, kind: input, shape index: {}]   ;;  %s2813_s12 = inlined_call_operand.vmem [shape: f32[2,1,32], index: 12, kind: input, shape index: {}]   ;;  %s2814_s13 = inlined_call_operand.vmem [shape: f32[1,32], index: 13, kind: input, shape index: {}]   ;;  %s2815_s14 = inlined_call_operand.vmem [shape: f32[1,32], index: 14, kind: input, shape index: {}]   ;;  %s2816_s15 = inlined_call_operand.vmem [shape: bf16[32,128], index: 15, kind: input, shape index: {}]   ;;  %s2817_s16 = inlined_call_operand.vmem [shape: f32[1,128], index: 16, kind: input, shape index: {}]   ;;  %s2818_s17 = inlined_call_operand.hbm [shape: f32[2,8,128], index: 17, kind: output, shape index: {}]  }
   0x1   :  { %2835 = sst [smem:[#allocation19_spill]] %s2801_s0 }
   0x2   :  { %2836 = sst [smem:[#allocation20_spill]] %s2802_s1 }
   0x3   :  { %2837 = sst [smem:[#allocation21_spill]] %s2804_s3 }
   0x4   :  { %2838 = sst [smem:[#allocation22_spill]] %s2806_s5 }
   0x5   :  { %2839 = sst [smem:[#allocation23_spill]] %s2814_s13 }
   0x6   :  { %2840 = sst [smem:[#allocation24_spill]] %s2815_s14 }
   0x7   :  { %2841 = sst [smem:[#allocation25_spill]] %s2816_s15 }
   0x8   :  { %2842 = sst [smem:[#allocation26_spill]] %s2817_s16 }
   0x9   :  { %2843 = sst [smem:[#allocation27_spill]] %s2818_s17 }
   0xa   :  { %22 = vsyncpa [#allocation4], 0 }
   0xb   :  { %24 = vsyncpa [#allocation4 + $0x1], 0  ;;  %s2440_s24 = smov 0   ;;  %s2442_s25 = smov 0  }
   0xc   :  { %s2444_s26 = smov 0   ;;  %s2446_s27 = smov 0  }
   0xd   :  { %s2448_s28 = smov 0   ;;  %s2450_s29 = smov 0  }
   0xe   :  { %s2452_s0 = smov 0   ;;  %s2454_s30 = smov 0  }
   0xf LB: > { %2844 = sst [smem:[#allocation6_spill]] %s2301_s24  ;;  %s1907_s18 = sadd.s32 4294967295, %s2329_s30   ;;  %s2329_s30 = sphi %s2454_s30, %s30_s30   ;;  %s2325_s0 = sphi %s2452_s0, %s2890_s0   ;;  %s2321_s29 = sphi %s2450_s29, %s2889_s29   ;;  %s2317_s28 = sphi %s2448_s28, %s2888_s28   ;;  %s2313_s27 = sphi %s2446_s27, %s2887_s27   ;;  %s2309_s26 = sphi %s2444_s26, %s2886_s26   ;;  %s2305_s25 = sphi %s2442_s25, %s2885_s25   ;;  %s2301_s24 = sphi %s2440_s24, %s2884_s24  }
  0x10   : > { %2845 = sst [smem:[#allocation7_spill]] %s2305_s25  ;;  %s1908_s19 = sadd.s32 4294967294, %s2329_s30  }
  0x11   : > { %2846 = sst [smem:[#allocation8_spill]] %s2309_s26  ;;  %s39_s1 = sadd.s32 1, %s2321_s29 }
  0x12   : > { %2847 = sst [smem:[#allocation9_spill]] %s2313_s27  ;;  %p40_p0 = scmp.ge.s32.totalorder %s39_s1, 2 }
  0x13   : > { %2848 = sst [smem:[#allocation10_spill]] %s2317_s28  ;;  %s42_s20 = sadd.s32 1, %s2325_s0 }
  0x14   : > { %2849 = sst [smem:[#allocation11_spill]] %s2321_s29  ;;  %p481_p1 = scmp.ne.s32.totalorder %s2309_s26, %s2305_s25 }
  0x15   : > { %2850 = sst [smem:[#allocation12_spill]] %s2325_s0  ;;  %p482_p2 = scmp.eq.s32.totalorder %s1907_s18, 3 }
  0x16   : > { %2851 = sst [smem:[#allocation13_spill]] %s2329_s30  ;;  %s2892_s1 = smov (%p40_p0, %s39_s1), 0 }
  0x17   : > { %2852 = sst [smem:[#allocation14_spill]] %s2892_s1  ;;  %s2894_s20 = smov (!%p40_p0, %s42_s20), %s2325_s0 }
  0x18   : > { %p2489_p3 = por %p482_p2, %p481_p1  ;;  %p487_p4 = scmp.ne.s32.totalorder %s2305_s25, %s2301_s24 }
  0x19   : > { %p44_p5 = scmp.ge.s32.totalorder %s2894_s20, 2  ;;  %p488_p6 = scmp.eq.s32.totalorder %s1908_s19, 3 }
  0x1a   : > { %s2853_s21 = scalar_select %p2489_p3, 1, 0 }
  0x1b   : > { %p1911_p7 = scmp.ge.s32.totalorder %s2329_s30, 1  ;;  %p605_p8 = scmp.lt.s32.totalorder %s2329_s30, 5 }
  0x1c   : > { %2854 = sst [smem:[#allocation15_spill]] %s2853_s21  ;;  %s2896_s20 = smov (%p44_p5, %s2894_s20), 0 }
  0x1d   : > { %2855 = sst [smem:[#allocation16_spill]] %s2896_s20  ;;  %p2499_p9 = por %p488_p6, %p487_p4 }
  0x1e   : > { %p606_p10 = pnand %p1911_p7, %p605_p8  ;;  %s468_s23 = ssub.s32 %s2325_s0, %s2896_s20 }
  0x1f   : > { %s2856_s22 = scalar_select %p2499_p9, 1, 0 }
  0x20   : > { %s471_s18 = sadd.s32 1, %s2309_s26  ;;  %p469_p11 = scmp.eq.s32.totalorder %s468_s23, 0 }
  0x21   : > { %2857 = sst [smem:[#allocation17_spill]] %s2856_s22  ;;  %609 = sbr.rel (%p606_p10) target bundleno = 3033 (0xbd9), region = 88 }
  0x22   : > { %s2507_s1 = scalar_select %p469_p11, %s2309_s26, %s471_s18  }
  0x23   : > { %s2824_s19 = sand.u32 (!%p606_p10), 1, %s2305_s25   ;;  %p700_p12 = scmp.lt.s32.totalorder (!%p606_p10), %s2317_s28, 1 }
  0x24   : > { %2858 = sst [smem:[#allocation18_spill]] %s2507_s1  ;;  %s2513_s29 = sshll.u32 (!%p606_p10), %s2824_s19, 3 }
  0x25   : > { %p704_p13 = scmp.lt.s32.totalorder (!%p606_p10), %s2313_s27, 1  ;;  %s2859_s0 = sld [smem:[#allocation19_spill]] (!%p606_p10) }
  0x26   : > { %s701_s22 = scalar_select %p700_p12, %s2317_s28, 1 }
  0x27   : > { %s2518_s24 = scalar_select %p704_p13, %s2313_s27, 1 }
  0x28   : > { %s1913_s23 = sshll.u32 %s701_s22, 3  ;;  %s2861_s3 = sld [smem:[#allocation21_spill]] }
  0x29   : > { %s1967_s16 = sshll.u32 %s2518_s24, 4  ;;  %s2862_s5 = sld [smem:[#allocation22_spill]] }
  0x2a   : > { %s731_s17 = scalar_lea.vmem %s2809_s8, %s2518_s24  ;;  %s2561_s22 = scalar_lea.vmem %s2810_s9, %s1967_s16 }
  0x2b   : > { %s703_s19 = scalar_lea.vmem %s2859_s0, %s1913_s23  ;;  %s739_s20 = scalar_lea.vmem %s2811_s10, %s2518_s24 }
  0x2c   : > { %s747_s25 = scalar_lea.vmem %s2813_s12, %s2518_s24  ;;  %s699_s13 = scalar_lea.vmem [#allocation3], %s2513_s29 }
  0x2d   : > { %s2863_s14 = sld [smem:[#allocation9_spill]] }
  0x2e   : > { %s2535_s15 = scalar_lea.vmem %s2861_s3, %s1967_s16 }
  0x2f   : > { %s2544_s23 = scalar_lea.vmem %s2862_s5, %s1967_s16  ;;  %s1970_s5 = sshll.u32 %s2518_s24, 6 }
  0x30   : > { %s2575_s28 = scalar_lea.vmem %s2812_s11, %s1970_s5 }
  0x33   : > { %p1922_p0 = scmp.ne.s32.totalorder %s2863_s14, 0 }
  0x35   : > { %752 = sbr.rel (%p1922_p0) target bundleno = 60 (0x3c), region = 92 }
  0x3a   : > { %v753_v0 = vld [vmem:[%s703_s19] sm:$0xff]  ;;  %vm754_vm0 = vcmask 261120  }
  0x3b   : > { %755 = vst.msk [vmem:[#allocation2] sm:$0xff] %vm754_vm0, %v753_v0 }
  0x3c PF: > { %vm793_vm1 = vcmask 261120   ;;  %v2197_v8 = vld [vmem:[%s2535_s15 + $0x8] sm:$0xff]   ;;  %v2331_v9 = vmov 0.0   ;;  %vm2332_vm2 = vmmov 0   ;;  %v2198_v10 = vld [vmem:[%s2535_s15] sm:$0xff]   ;;  %s2864_s16 = sld [smem:[#allocation20_spill]]  ;;  %s2866_s18 = scalar_lea.vmem %s2803_s2, %s2518_s24 }
  0x3d   : > { %2008 = vmatprep.subr.bf16.mxu0 %v2331_v9  ;;  %2012 = vmatprep.mubr.msk.bf16.mxu0 %vm2332_vm2, %v2331_v9  ;;  %v1924_v17 = vld [vmem:[%s2866_s18] ss:$0 sm:$0xff]  ;;  %s2867_s30 = scalar_lea.vmem %s2805_s4, %s2518_s24  ;;  %s2333_s1 = smov 96   ;;  %vm890_vm3 = vcmask 64512   ;;  %vm954_vm4 = vcmask 1043456   ;;  %vm1342_vm5 = vcmask 130048  }
  0x3e   : > { %2009 = vmatpush3.bf16.msra.mxu0 %v2197_v8  ;;  %2028 = vmatprep.subr.bf16.mxu1 %v2331_v9  ;;  %v1925_v21 = vld [vmem:[%s2867_s30] ss:$0 sm:$0xff]  ;;  %s2334_s21 = smov 120   ;;  %s2335_s14 = smov 88   ;;  %vm1344_vm6 = vcmask 195584  }
  0x3f   : > { %2010 = vmatprep.subr.bf16.mxu0 %v2331_v9  ;;  %2030 = vmatprep.mubr.msk.bf16.mxu1 %vm2332_vm2, %v2331_v9  ;;  %s2336_s3 = smov 80   ;;  %s2337_s5 = smov 112  }
  0x40   : > { %s2340_s19 = smov 64   ;;  %s2341_s27 = smov 56  }
  0x41   : > { %s2342_s18 = smov 48   ;;  %s2343_s0 = smov 40  }
  0x42   : > { %v2579_v1 = vld [vmem:[#allocation2] sm:$0xff]  ;;  %2011 = vmatpush3.bf16.msra.mxu0 %v2198_v10  ;;  %s2865_s15 = scalar_lea.vmem %s2864_s16, %s2518_s24  ;;  %s2338_s16 = smov 72  }
  0x43   : > { %v794_v2 = vsel %vm793_vm1, %v2579_v1, 0.0  ;;  %2016 = vmatprep.subr.bf16.mxu0 %v2331_v9  ;;  %v1923_v15 = vld [vmem:[%s2865_s15] ss:$0 sm:$0xff]  ;;  %s2339_s15 = smov 104   ;;  %s2344_s26 = smov 8  }
  0x44   : > { %795 = vadd.xlane.f32.xlu0 %v794_v2  ;;  %s2345_s30 = smov 16  }
  0xcd   : > { %v796_v3 = vpop.xlane.xlu0 %795 }
  0xce   : > { %v798_v4 = vmul.f32 0.03125, %v796_v3 }
  0xd0   : > { %v799_v5 = vsub.f32 %v2579_v1, %v798_v4 }
  0xd2   : > { %v800_v6 = vmul.f32 %v799_v5, %v799_v5 }
  0xd4   : > { %v801_v7 = vsel %vm793_vm1, %v800_v6, 0.0 }
  0xd5   : > { %802 = vadd.xlane.f32.xlu0 %v801_v7 }
 0x15e   : > { %v803_v11 = vpop.xlane.xlu0 %802 }
 0x15f   : > { %v804_v12 = vmul.f32 0.03125, %v803_v11 }
 0x161   : > { %v805_v13 = vadd.f32 1e-06, %v804_v12 }
 0x163   : > { %2211 = vrsqrt.f32 %v805_v13 }
 0x170   : > { %v2212_v14 = vpop.eup %2211 }
 0x171   : > { %v807_v16 = vmul.f32 %v2212_v14, %v799_v5 }
 0x173   : > { %v814_v18 = vmul.f32 %v1923_v15, %v807_v16 }
 0x175   : > { %v821_v19 = vadd.f32 %v1924_v17, %v814_v18 }
 0x177   : > { %v822_v20 = vpack.c.bf16 %v821_v19, %v821_v19 }
 0x179   : > { %2013 = vmatmul.mubr.msk.bf16.vlgmr.msra.gmra.mxu0 %vm793_vm1, %v822_v20 }
 0x17a   : > { %2018 = vmatprep.mubr.msk.bf16.mxu0 %vm2332_vm2, %v2331_v9 }
 0x239   : > { %v878_v22 = vpop.f32.mrf.mxu0 }
 0x23a   : > { %v879_v23 = vadd.f32 %v1925_v21, %v878_v22 }
 0x23b   : > { %v2014_v24 = vpop.f32.mrf.mxu0 }
 0x23c   : > { %v884_v25 = vmul.f32 0.35355338, %v879_v23  ;;  %v2613_v26 = vpack.c.bf16 %v879_v23, %v879_v23 }
 0x23d   : > { %v881_v27 = vpop.f32.mrf.mxu0 }
 0x23e   : > { %v885_v28 = vpack.c.bf16 %v884_v25, %v884_v25  ;;  %888 = vrot.lane.b32.xlu1 %v2613_v26, %s2333_s1  ;;  %s2346_s1 = smov 24  }
 0x23f   : > { %v2015_v29 = vpop.f32.mrf.mxu0 }
 0x240   : > { %999 = vrot.lane.b32.xlu0 %v885_v28, %s2334_s21 }
 0x242   : > { %1001 = vrot.lane.b32.xlu1 %v2613_v26, %s2335_s14  ;;  %s2868_s14 = scalar_lea.vmem %s2807_s6, %s2518_s24 }
 0x246   : > { %1111 = vrot.lane.b32.xlu1 %v2613_v26, %s2336_s3 }
 0x24a   : > { %1109 = vrot.lane.b32.xlu1 %v885_v28, %s2337_s5  ;;  %s2869_s5 = scalar_lea.vmem %s2808_s7, %s2518_s24 }
 0x24e   : > { %1221 = vrot.lane.b32.xlu1 %v2613_v26, %s2338_s16 }
 0x252   : > { %1219 = vrot.lane.b32.xlu1 %v885_v28, %s2339_s15 }
 0x2b0   : > { %v889_v30 = vpop.permute.xlu1 %888 }
 0x2b1   : > { %v895_v31 = vsel %vm890_vm3, %v889_v30, 0 }
 0x2b2   : > { %2017 = vmatpush3.bf16.xpose.msra.mxu0 %v895_v31  ;;  %v1000_v35 = vpop.permute.xlu0 %999 }
 0x2b3   : > { %2022 = vmatprep.subr.bf16.mxu0 %v2331_v9 }
 0x2b4   : > { %v1002_v32 = vpop.permute.xlu1 %1001 }
 0x2b5   : > { %v1007_v33 = vsel %vm890_vm3, %v1002_v32, 0 }
 0x2b6   : > { %2029 = vmatpush3.bf16.xpose.msra.mxu1 %v1007_v33 }
 0x2b7   : > { %2040 = vmatprep.subr.bf16.mxu1 %v2331_v9 }
 0x2b8   : > { %v1112_v34 = vpop.permute.xlu1 %1111 }
 0x2b9   : > { %2019 = vmatmul.mubr.msk.bf16.vlgmr.msra.gmra.mxu0 %vm890_vm3, %v885_v28  ;;  %v1117_v37 = vsel %vm890_vm3, %v1112_v34, 0 }
 0x2ba   : > { %2024 = vmatprep.mubr.msk.bf16.mxu0 %vm2332_vm2, %v2331_v9 }
 0x2bc   : > { %v1110_v36 = vpop.permute.xlu1 %1109 }
 0x2bd   : > { %2031 = vmatmul.mubr.msk.bf16.vlgmr.msra.gmra.mxu1 %vm890_vm3, %v1000_v35 }
 0x2be   : > { %2041 = vmatpush3.bf16.xpose.msra.mxu1 %v1117_v37  ;;  %2042 = vmatprep.mubr.msk.bf16.mxu1 %vm2332_vm2, %v2331_v9 }
 0x2bf   : > { %2052 = vmatprep.subr.bf16.mxu1 %v2331_v9 }
 0x2c0   : > { %v1222_v38 = vpop.permute.xlu1 %1221 }
 0x2c1   : > { %v1227_v39 = vsel %vm890_vm3, %v1222_v38, 0 }
 0x2c4   : > { %v1220_v40 = vpop.permute.xlu1 %1219 }
 0x2c5   : > { %2043 = vmatmul.mubr.msk.bf16.vlgmr.msra.gmra.mxu1 %vm890_vm3, %v1110_v36 }
 0x2c6   : > { %2053 = vmatpush3.bf16.xpose.msra.mxu1 %v1227_v39  ;;  %2054 = vmatprep.mubr.msk.bf16.mxu1 %vm2332_vm2, %v2331_v9 }
 0x2c7   : > { %2064 = vmatprep.subr.bf16.mxu1 %v2331_v9 }
 0x2cd   : > { %2055 = vmatmul.mubr.msk.bf16.vlgmr.msra.gmra.mxu1 %vm890_vm3, %v1220_v40 }
 0x2ce   : > { %2068 = vmatprep.mubr.msk.bf16.mxu1 %vm2332_vm2, %v2331_v9 }
 0x379   : > { %v931_v41 = vpop.f32.mrf.mxu0 }
 0x37a   : > { %v937_v42 = vsel %vm890_vm3, %v931_v41, -inf }
 0x37b   : > { %938 = vmax.xlane.f32.xlu1 %v937_v42  ;;  %v2020_v43 = vpop.f32.mrf.mxu0 }
 0x37d   : > { %v934_v44 = vpop.f32.mrf.mxu0  ;;  %v1043_v45 = vpop.f32.mrf.mxu1 }
 0x37e   : > { %v1049_v46 = vsel %vm890_vm3, %v1043_v45, -inf }
 0x37f   : > { %1050 = vmax.xlane.f32.xlu0 %v1049_v46  ;;  %v2021_v47 = vpop.f32.mrf.mxu0  ;;  %v2032_v48 = vpop.f32.mrf.mxu1 }
 0x381   : > { %v1046_v49 = vpop.f32.mrf.mxu1 }
 0x383   : > { %v2033_v50 = vpop.f32.mrf.mxu1 }
 0x385   : > { %v1153_v51 = vpop.f32.mrf.mxu1 }
 0x386   : > { %v1159_v52 = vsel %vm890_vm3, %v1153_v51, -inf }
 0x387   : > { %v2044_v53 = vpop.f32.mrf.mxu1  ;;  %1160 = vmax.xlane.f32.xlu1 %v1159_v52  ;;  %v2200_v52 = vld [vmem:[%s2544_s23] sm:$0xff]  }
 0x389   : > { %v1156_v54 = vpop.f32.mrf.mxu1 }
 0x38b   : > { %v2045_v55 = vpop.f32.mrf.mxu1 }
 0x38d   : > { %v1263_v56 = vpop.f32.mrf.mxu1 }
 0x38e   : > { %v1269_v57 = vsel %vm890_vm3, %v1263_v56, -inf }
 0x38f   : > { %1270 = vmax.xlane.f32.xlu0 %v1269_v57  ;;  %v2056_v58 = vpop.f32.mrf.mxu1 }
 0x391   : > { %v1266_v59 = vpop.f32.mrf.mxu1 }
 0x393   : > { %v2057_v60 = vpop.f32.mrf.mxu1 }
 0x404   : > { %v939_v61 = vpop.xlane.xlu1 %938 }
 0x405   : > { %v940_v62 = vsub.f32 %v931_v41, %v939_v61 }
 0x407   : > { %v941_v63 = vmul.f32 1.442695, %v940_v62 }
 0x408   : > { %v1051_v0 = vpop.xlane.xlu0 %1050 }
 0x409   : > { %2213 = vpow2.f32 %v941_v63  ;;  %v1052_v2 = vsub.f32 %v1043_v45, %v1051_v0 }
 0x40b   : > { %v1053_v3 = vmul.f32 1.442695, %v1052_v2 }
 0x40d   : > { %2215 = vpow2.f32 %v1053_v3 }
 0x410   : > { %v1161_v14 = vpop.xlane.xlu1 %1160 }
 0x411   : > { %v1162_v15 = vsub.f32 %v1153_v51, %v1161_v14  ;;  %v2199_v51 = vld [vmem:[%s2544_s23 + $0x8] sm:$0xff]  }
 0x412   : > { %2065 = vmatpush3.bf16.msra.mxu1 %v2199_v51 }
 0x413   : > { %v1163_v16 = vmul.f32 1.442695, %v1162_v15  ;;  %2066 = vmatprep.subr.bf16.mxu1 %v2331_v9 }
 0x416   : > { %v2214_v4 = vpop.eup %2213  ;;  %2067 = vmatpush3.bf16.msra.mxu1 %v2200_v52 }
 0x417   : > { %v943_v5 = vsel %vm890_vm3, %v2214_v4, 0.0  ;;  %2080 = vmatprep.subr.bf16.mxu1 %v2331_v9 }
 0x418   : > { %v1271_v6 = vpop.xlane.xlu0 %1270  ;;  %944 = vadd.xlane.f32.xlu1 %v943_v5  ;;  %v1940_v5 = vld [vmem:[%s2868_s14] ss:$0 sm:$0xff] }
 0x419   : > { %v1272_v7 = vsub.f32 %v1263_v56, %v1271_v6 }
 0x41a   : > { %v2216_v8 = vpop.eup %2215 }
 0x41b   : > { %v1273_v10 = vmul.f32 1.442695, %v1272_v7  ;;  %v1055_v11 = vsel %vm890_vm3, %v2216_v8, 0.0 }
 0x41c   : > { %1056 = vadd.xlane.f32.xlu0 %v1055_v11 }
 0x41d   : > { %2217 = vpow2.f32 %v1273_v10 }
 0x41e   : > { %2219 = vpow2.f32 %v1163_v16 }
 0x429   : > { %949 = vrot.lane.b32.xlu1 %v2613_v26, %s2340_s19 }
 0x42a   : > { %v2218_v12 = vpop.eup %2217 }
 0x42b   : > { %v1275_v13 = vsel %vm890_vm3, %v2218_v12, 0.0  ;;  %v2220_v17 = vpop.eup %2219 }
 0x42c   : > { %1276 = vadd.xlane.f32.xlu0 %v1275_v13  ;;  %v1165_v18 = vsel %vm890_vm3, %v2220_v17, 0.0 }
 0x442   : > { %1061 = vrot.lane.b32.xlu0 %v2613_v26, %s2341_s27 }
 0x44d   : > { %1166 = vadd.xlane.f32.xlu1 %v1165_v18 }
 0x45e   : > { %1171 = vrot.lane.b32.xlu1 %v2613_v26, %s2342_s18 }
 0x462   : > { %1281 = vrot.lane.b32.xlu1 %v2613_v26, %s2343_s0 }
 0x4a1   : > { %v945_v19 = vpop.xlane.xlu1 %944 }
 0x4a2   : > { %2221 = vrcp.f32 %v945_v19  ;;  %v2202_v19 = vld [vmem:[%s2561_s22] sm:$0xff]  }
 0x4a5   : > { %v1057_v20 = vpop.xlane.xlu0 %1056  ;;  %v950_v21 = vpop.permute.xlu1 %949 }
 0x4a6   : > { %v956_v22 = vsel %vm954_vm4, %v950_v21, 0  ;;  %2223 = vrcp.f32 %v1057_v20  ;;  %v2203_v20 = vld [vmem:[%s2575_s28 + $0x38] sm:$0xff]   ;;  %v2204_v21 = vld [vmem:[%s2575_s28 + $0x30] sm:$0xff]  }
 0x4a7   : > { %2023 = vmatpush3.bf16.msra.mxu0 %v956_v22 }
 0x4a8   : > { %2034 = vmatprep.subr.bf16.mxu0 %v2331_v9 }
 0x4af   : > { %v2222_v23 = vpop.eup %2221 }
 0x4b0   : > { %v947_v24 = vmul.f32 %v2222_v23, %v2214_v4 }
 0x4b2   : > { %v948_v25 = vpack.c.bf16 %v947_v24, %v947_v24 }
 0x4b3   : > { %v2224_v27 = vpop.eup %2223 }
 0x4b4   : > { %2025 = vmatmul.mubr.msk.bf16.vlgmr.msra.gmra.mxu0 %vm890_vm3, %v948_v25  ;;  %v1059_v26 = vmul.f32 %v2224_v27, %v2216_v8  ;;  %v1941_v27 = vld [vmem:[%s2869_s5] ss:$0 sm:$0xff] }
 0x4b5   : > { %v1277_v28 = vpop.xlane.xlu0 %1276  ;;  %2036 = vmatprep.mubr.msk.bf16.mxu0 %vm2332_vm2, %v2331_v9 }
 0x4b6   : > { %v1060_v31 = vpack.c.bf16 %v1059_v26, %v1059_v26  ;;  %v1942_v26 = vld [vmem:[%s731_s17] ss:$0 sm:$0xff] }
 0x4b9   : > { %v1062_v29 = vpop.permute.xlu0 %1061 }
 0x4ba   : > { %v1067_v30 = vsel %vm954_vm4, %v1062_v29, 0 }
 0x4bb   : > { %2035 = vmatpush3.bf16.msra.mxu0 %v1067_v30 }
 0x4bc   : > { %2046 = vmatprep.subr.bf16.mxu0 %v2331_v9 }
 0x4be   : > { %2037 = vmatmul.mubr.msk.bf16.vlgmr.msra.gmra.mxu0 %vm890_vm3, %v1060_v31 }
 0x4bf   : > { %2048 = vmatprep.mubr.msk.bf16.mxu0 %vm2332_vm2, %v2331_v9 }
 0x4d6   : > { %v1167_v32 = vpop.xlane.xlu1 %1166 }
 0x4d7   : > { %2225 = vrcp.f32 %v1167_v32  ;;  %v2205_v32 = vld [vmem:[%s2575_s28 + $0x28] sm:$0xff]  }
 0x4d8   : > { %2227 = vrcp.f32 %v1277_v28 }
 0x4da   : > { %v1172_v33 = vpop.permute.xlu1 %1171 }
 0x4db   : > { %v1177_v34 = vsel %vm954_vm4, %v1172_v33, 0  ;;  %v2206_v33 = vld [vmem:[%s2575_s28 + $0x20] sm:$0xff]  }
 0x4dc   : > { %2047 = vmatpush3.bf16.msra.mxu0 %v1177_v34  ;;  %v2207_v34 = vld [vmem:[%s2575_s28 + $0x18] sm:$0xff]  }
 0x4dd   : > { %2058 = vmatprep.subr.bf16.mxu0 %v2331_v9 }
 0x4de   : > { %v1282_v37 = vpop.permute.xlu1 %1281 }
 0x4df   : > { %v1287_v40 = vsel %vm954_vm4, %v1282_v37, 0  ;;  %v2210_v37 = vld [vmem:[%s2575_s28] sm:$0xff]  }
 0x4e4   : > { %v2226_v35 = vpop.eup %2225 }
 0x4e5   : > { %v1169_v36 = vmul.f32 %v2226_v35, %v2220_v17  ;;  %v2228_v39 = vpop.eup %2227  ;;  %v2208_v35 = vld [vmem:[%s2575_s28 + $0x10] sm:$0xff]  }
 0x4e6   : > { %v1279_v41 = vmul.f32 %v2228_v39, %v2218_v12 }
 0x4e7   : > { %v1170_v38 = vpack.c.bf16 %v1169_v36, %v1169_v36  ;;  %v2209_v36 = vld [vmem:[%s2575_s28 + $0x8] sm:$0xff]  }
 0x4e8   : > { %v1280_v42 = vpack.c.bf16 %v1279_v41, %v1279_v41 }
 0x4e9   : > { %2049 = vmatmul.mubr.msk.bf16.vlgmr.msra.gmra.mxu0 %vm890_vm3, %v1170_v38  ;;  %v1943_v38 = vld [vmem:[%s739_s20] ss:$0 sm:$0xff]  ;;  %s2870_s20 = sld [smem:[#allocation9_spill]] }
 0x4ea   : > { %2059 = vmatpush3.bf16.msra.mxu0 %v1287_v40  ;;  %2060 = vmatprep.mubr.msk.bf16.mxu0 %vm2332_vm2, %v2331_v9 }
 0x4eb   : > { %2072 = vmatprep.subr.bf16.mxu0 %v2331_v9 }
 0x4ef   : > { %p1956_p1 = scmp.ne.s32.totalorder %s2870_s20, 1 }
 0x4f0   : > { %s2871_s18 = sld [smem:[#allocation25_spill]] (!%p1956_p1) }
 0x4f1   : > { %2061 = vmatmul.mubr.msk.bf16.vlgmr.msra.gmra.mxu0 %vm890_vm3, %v1280_v42  ;;  %s2872_s23 = sld [smem:[#allocation23_spill]] (!%p1956_p1) }
 0x4f2   : > { %2076 = vmatprep.mubr.msk.bf16.mxu0 %vm2332_vm2, %v2331_v9  ;;  %s2874_s16 = sld [smem:[#allocation26_spill]] (!%p1956_p1) }
 0x574   : > { %v992_v43 = vpop.f32.mrf.mxu0 }
 0x576   : > { %v2026_v44 = vpop.f32.mrf.mxu0 }
 0x578   : > { %v995_v45 = vpop.f32.mrf.mxu0 }
 0x57a   : > { %v2027_v46 = vpop.f32.mrf.mxu0 }
 0x57e   : > { %v1103_v47 = vpop.f32.mrf.mxu0 }
 0x57f   : > { %1330 = vrot.lane.b32.xlu0 %v1103_v47, %s2344_s26 }
 0x580   : > { %v2038_v48 = vpop.f32.mrf.mxu0 }
 0x582   : > { %v1106_v49 = vpop.f32.mrf.mxu0 }
 0x583   : > { %v1955_v49 = vld [vmem:[%s747_s25] ss:$0 sm:$0xff] }
 0x584   : > { %v2039_v50 = vpop.f32.mrf.mxu0 }
 0x5a9   : > { %v1213_v53 = vpop.f32.mrf.mxu0 }
 0x5aa   : > { %1334 = vrot.lane.b32.xlu1 %v1213_v53, %s2345_s30 }
 0x5ab   : > { %v2050_v54 = vpop.f32.mrf.mxu0 }
 0x5ad   : > { %v1216_v55 = vpop.f32.mrf.mxu0 }
 0x5af   : > { %v2051_v56 = vpop.f32.mrf.mxu0 }
 0x5b1   : > { %v1323_v57 = vpop.f32.mrf.mxu0 }
 0x5b2   : > { %1338 = vrot.lane.b32.xlu0 %v1323_v57, %s2346_s1 }
 0x5b3   : > { %v2062_v58 = vpop.f32.mrf.mxu0 }
 0x5b5   : > { %v1326_v59 = vpop.f32.mrf.mxu0 }
 0x5b7   : > { %v2063_v60 = vpop.f32.mrf.mxu0 }
 0x5f1   : > { %v1331_v61 = vpop.permute.xlu0 %1330 }
 0x5f2   : > { %v1341_v63 = vsel %vm890_vm3, %v992_v43, %v1331_v61 }
 0x61c   : > { %v1335_v62 = vpop.permute.xlu1 %1334 }
 0x61d   : > { %v1343_v0 = vsel %vm1342_vm5, %v1341_v63, %v1335_v62 }
 0x624   : > { %v1339_v2 = vpop.permute.xlu0 %1338 }
 0x625   : > { %v1345_v3 = vsel %vm1344_vm6, %v1343_v0, %v1339_v2 }
 0x626   : > { %v1346_v4 = vpack.c.bf16 %v1345_v3, %v1345_v3 }
 0x628   : > { %2069 = vmatmul.mubr.msk.bf16.vlgmr.msra.gmra.mxu1 %vm793_vm1, %v1346_v4 }
 0x629   : > { %2096 = vmatprep.mubr.msk.bf16.mxu1 %vm2332_vm2, %v2331_v9  ;;  %2081 = vmatpush3.bf16.msra.mxu1 %v2203_v20 }
 0x62a   : > { %2082 = vmatprep.subr.bf16.mxu1 %v2331_v9 }
 0x62d   : > { %2083 = vmatpush3.bf16.msra.mxu1 %v2204_v21 }
 0x62e   : > { %2084 = vmatprep.subr.bf16.mxu1 %v2331_v9 }
 0x631   : > { %2085 = vmatpush3.bf16.msra.mxu1 %v2205_v32 }
 0x632   : > { %2086 = vmatprep.subr.bf16.mxu1 %v2331_v9 }
 0x635   : > { %2087 = vmatpush3.bf16.msra.mxu1 %v2206_v33 }
 0x636   : > { %2088 = vmatprep.subr.bf16.mxu1 %v2331_v9 }
 0x639   : > { %2089 = vmatpush3.bf16.msra.mxu1 %v2207_v34 }
 0x63a   : > { %2090 = vmatprep.subr.bf16.mxu1 %v2331_v9 }
 0x63d   : > { %2091 = vmatpush3.bf16.msra.mxu1 %v2208_v35 }
 0x63e   : > { %2092 = vmatprep.subr.bf16.mxu1 %v2331_v9 }
 0x641   : > { %2093 = vmatpush3.bf16.msra.mxu1 %v2209_v36 }
 0x642   : > { %2094 = vmatprep.subr.bf16.mxu1 %v2331_v9 }
 0x645   : > { %2095 = vmatpush3.bf16.msra.mxu1 %v2210_v37 }
 0x6e8   : > { %v1396_v6 = vpop.f32.mrf.mxu1 }
 0x6e9   : > { %v1402_v7 = vadd.f32 %v1396_v6, %v2579_v1  ;;  %v2201_v1 = vld [vmem:[%s2561_s22 + $0x8] sm:$0xff]   ;;  %s2873_s22 = sld [smem:[#allocation24_spill]] (!%p1956_p1) }
 0x6ea   : > { %v2070_v8 = vpop.f32.mrf.mxu1  ;;  %2073 = vmatpush3.bf16.msra.mxu0 %v2201_v1 }
 0x6eb   : > { %v2685_v10 = vadd.f32 %v1940_v5, %v1402_v7  ;;  %2074 = vmatprep.subr.bf16.mxu0 %v2331_v9 }
 0x6ec   : > { %v1399_v11 = vpop.f32.mrf.mxu1 }
 0x6ed   : > { %v1410_v12 = vsel %vm793_vm1, %v2685_v10, 0.0 }
 0x6ee   : > { %1411 = vadd.xlane.f32.xlu1 %v1410_v12  ;;  %v2071_v13 = vpop.f32.mrf.mxu1  ;;  %2075 = vmatpush3.bf16.msra.mxu0 %v2202_v19 }
 0x777   : > { %v1412_v14 = vpop.xlane.xlu1 %1411 }
 0x778   : > { %v1413_v15 = vmul.f32 0.03125, %v1412_v14 }
 0x77a   : > { %v1414_v16 = vsub.f32 %v2685_v10, %v1413_v15 }
 0x77c   : > { %v1415_v17 = vmul.f32 %v1414_v16, %v1414_v16 }
 0x77e   : > { %v1416_v18 = vsel %vm793_vm1, %v1415_v17, 0.0 }
 0x77f   : > { %1417 = vadd.xlane.f32.xlu0 %v1416_v18 }
 0x808   : > { %v1418_v22 = vpop.xlane.xlu0 %1417 }
 0x809   : > { %v1419_v23 = vmul.f32 0.03125, %v1418_v22 }
 0x80b   : > { %v1420_v24 = vadd.f32 1e-06, %v1419_v23 }
 0x80d   : > { %2229 = vrsqrt.f32 %v1420_v24 }
 0x81a   : > { %v2230_v25 = vpop.eup %2229 }
 0x81b   : > { %v1422_v28 = vmul.f32 %v2230_v25, %v1414_v16 }
 0x81d   : > { %v1429_v29 = vmul.f32 %v1941_v27, %v1422_v28 }
 0x81f   : > { %v1436_v30 = vadd.f32 %v1942_v26, %v1429_v29 }
 0x821   : > { %v1437_v31 = vpack.c.bf16 %v1436_v30, %v1436_v30 }
 0x823   : > { %2077 = vmatmul.mubr.msk.bf16.vlgmr.msra.gmra.mxu0 %vm793_vm1, %v1437_v31 }
 0x8e3   : > { %v1493_v39 = vpop.f32.mrf.mxu0 }
 0x8e4   : > { %v1494_v40 = vadd.f32 %v1943_v38, %v1493_v39 }
 0x8e5   : > { %v2078_v41 = vpop.f32.mrf.mxu0 }
 0x8e6   : > { %v1500_v42 = vmul.f32 0.70710677, %v1494_v40  ;;  %v1499_v46 = vmul.f32 0.5, %v1494_v40 }
 0x8e7   : > { %v1496_v43 = vpop.f32.mrf.mxu0 }
 0x8e8   : > { %2231 = verf.f32 %v1500_v42 }
 0x8e9   : > { %v2079_v44 = vpop.f32.mrf.mxu0 }
 0x8f5   : > { %v2232_v45 = vpop.eup %2231 }
 0x8f6   : > { %v1502_v47 = vadd.f32 1.0, %v2232_v45 }
 0x8f8   : > { %v1503_v48 = vmul.f32 %v1502_v47, %v1499_v46 }
 0x8fa   : > { %v1504_v9 = vpack.c.bf16 %v1503_v48, %v1503_v48 }
 0x8fc   : > { %2097 = vmatmul.mubr.bf16.vlgmr.msra.gmra.mxu1 %v1504_v9 }
 0x9bc   : > { %v1587_v50 = vpop.f32.mrf.mxu1 }
 0x9bd   : > { %v1593_v51 = vadd.f32 %v1587_v50, %v2685_v10 }
 0x9be   : > { %v2098_v52 = vpop.f32.mrf.mxu1  ;;  %1605 = sbr.rel (%p1956_p1) target bundleno = 3008 (0xbc0), region = 96 }
 0x9bf   : > { %v1600_v53 = vadd.f32 %v1955_v49, %v1593_v51 }
 0x9c0   : > { %v1590_v54 = vpop.f32.mrf.mxu1 }
 0x9c1   : > { %1601 = vst.msk [vmem:[#allocation2] sm:$0xff] %vm793_vm1, %v1600_v53 }
 0x9c2   : > { %v2099_v55 = vpop.f32.mrf.mxu1 }
 0x9c3   : > { %v1608_v56 = vsel %vm793_vm1, %v1600_v53, 0.0  ;;  %v2233_v62 = vld [vmem:[%s2871_s18 + $0x8] sm:$0xff]   ;;  %v2347_v63 = vmov 0.0   ;;  %vm2348_vm7 = vmmov 0   ;;  %v2234_v0 = vld [vmem:[%s2871_s18] sm:$0xff]  }
 0x9c4   : > { %1609 = vadd.xlane.f32.xlu0 %v1608_v56  ;;  %2100 = vmatprep.subr.bf16.mxu0 %v2347_v63  ;;  %v1957_v6 = vld [vmem:[%s2872_s23] ss:$0 sm:$0xff] }
 0x9c5   : > { %2104 = vmatprep.mubr.msk.bf16.mxu0 %vm2348_vm7, %v2347_v63  ;;  %2101 = vmatpush3.bf16.msra.mxu0 %v2233_v62  ;;  %v1958_v8 = vld [vmem:[%s2873_s22] ss:$0 sm:$0xff] }
 0x9c6   : > { %2102 = vmatprep.subr.bf16.mxu0 %v2347_v63  ;;  %v1959_v13 = vld [vmem:[%s2874_s16] ss:$0 sm:$0xff] }
 0x9c9   : > { %2103 = vmatpush3.bf16.msra.mxu0 %v2234_v0 }
 0xa4d   : > { %v1610_v57 = vpop.xlane.xlu0 %1609 }
 0xa4e   : > { %v1611_v58 = vmul.f32 0.03125, %v1610_v57 }
 0xa50   : > { %v1612_v59 = vsub.f32 %v1600_v53, %v1611_v58 }
 0xa52   : > { %v1613_v60 = vmul.f32 %v1612_v59, %v1612_v59 }
 0xa54   : > { %v1614_v61 = vsel %vm793_vm1, %v1613_v60, 0.0 }
 0xa55   : > { %1615 = vadd.xlane.f32.xlu0 %v1614_v61 }
 0xade   : > { %v1616_v2 = vpop.xlane.xlu0 %1615 }
 0xadf   : > { %v1617_v3 = vmul.f32 0.03125, %v1616_v2 }
 0xae1   : > { %v1618_v4 = vadd.f32 1e-06, %v1617_v3 }
 0xae3   : > { %2235 = vrsqrt.f32 %v1618_v4 }
 0xaf0   : > { %v2236_v5 = vpop.eup %2235 }
 0xaf1   : > { %v1620_v7 = vmul.f32 %v2236_v5, %v1612_v59 }
 0xaf3   : > { %v1627_v10 = vmul.f32 %v1957_v6, %v1620_v7 }
 0xaf5   : > { %v1634_v11 = vadd.f32 %v1958_v8, %v1627_v10 }
 0xaf7   : > { %v1635_v12 = vpack.c.bf16 %v1634_v11, %v1634_v11 }
 0xaf9   : > { %2105 = vmatmul.mubr.msk.bf16.vlgmr.msra.gmra.mxu0 %vm793_vm1, %v1635_v12 }
 0xbb9   : > { %v1696_v14 = vpop.f32.mrf.mxu0 }
 0xbba   : > { %v1697_v15 = vadd.f32 %v1959_v13, %v1696_v14 }
 0xbbb   : > { %v2106_v16 = vpop.f32.mrf.mxu0 }
 0xbbc   : > { %1702 = vst [vmem:[%s699_s13] sm:$0xff] %v1697_v15 }
 0xbbd   : > { %v1699_v17 = vpop.f32.mrf.mxu0 }
 0xbbf   : > { %v2107_v18 = vpop.f32.mrf.mxu0 }
 0xbc0 PF: > { %s2875_s15 = sld [smem:[#allocation10_spill]]  ;;  %s1717_s0 = sshll.u32 %s699_s13, 4  ;;  %s1718_s0 = int_to_ptr.vmem [resolvable:$true] %s1717_s0 }
 0xbc1   : > { %s2876_s17 = sld [smem:[#allocation7_spill]]  ;;  %s2237_s23 = scalar_lea.vmem %s1718_s0, 128 }
 0xbc2   : > { %s2878_s24 = sld [smem:[#allocation27_spill]]  ;;  %p2238_p2 = scmp.ne.s32.totalorder %s1718_s0, %s2237_s23 }
 0xbc3   : > { %s2349_s21 = smov [#allocation3]  }
 0xbc4   : > { %p2239_p4 = pnand %p2238_p2, %p2489_p3  ;;  %s2241_s14 = sshll.u32 %s2349_s21, 4  ;;  %s2242_s14 = int_to_ptr.vmem [resolvable:$false] %s2241_s14 }
 0xbc5   : > { %s2243_s22 = scalar_lea.vmem %s2242_s14, 256  ;;  %p2244_p6 = scmp.lt.s32.totalorder %s1718_s0, %s2242_s14 }
 0xbc6   : > { %s1964_s28 = sshll.u32 %s2875_s15, 7  ;;  %p2240_p5 = pneg %p2239_p4 }
 0xbc7   : > { %s2880_s26 = sand.u32 1, %s2876_s17   ;;  %p2245_p7 = scmp.lt.s32.totalorder %s2243_s22, %s2237_s23 }
 0xbc8   : > { %s2879_s1 = smov %s2878_s24  ;;  %s1715_s25 = scalar_lea.hbm %s2878_s24, %s1964_s28 }
 0xbc9   : > { %s1704_s30 = scalar_lea.sflag [#allocation4], %s2880_s26  ;;  %p2246_p8 = por %p2245_p7, %p2244_p6 }
 0xbcb   : > { %p2247_p10 = pnand %p2246_p8, %p2240_p5 }
 0xbcd   : > { %2250 = shalt.err (!%p2247_p10)
}
 0xbce   : > { %s2251_s3 = scalar_lea.hbm %s1715_s25, 128  ;;  %s2255_s5 = scalar_lea.hbm %s2879_s1, 256 }
 0xbcf   : > { %p2252_p11 = scmp.ne.s32.totalorder %s1715_s25, %s2251_s3  ;;  %p2256_p0 = scmp.lt.s32.totalorder %s1715_s25, %s2879_s1 }
 0xbd0   : > { %p2257_p1 = scmp.lt.s32.totalorder %s2255_s5, %s2251_s3 }
 0xbd1   : > { %p2253_p12 = pnand %p2252_p11, %p2489_p3 }
 0xbd2   : > { %p2258_p2 = por %p2257_p1, %p2256_p0 }
 0xbd3   : > { %p2254_p13 = pneg %p2253_p12 }
 0xbd5   : > { %p2259_p4 = pnand %p2258_p2, %p2254_p13 }
 0xbd7   : > { %2262 = shalt.err (!%p2259_p4)
}
 0xbd8   : > { %2108 = dma.vmem_to_hbm [thread:$0]  (%p2489_p3), %s1718_s0, 128, %s1715_s25, %s1704_s30  }
 0xbd9 PF: > { %s2881_s17 = sld [smem:[#allocation13_spill]] }
 0xbda   : > { %s2882_s28 = sld [smem:[#allocation6_spill]] }
 0xbdf   : > { %p2114_p5 = scmp.ge.s32.totalorder %s2881_s17, 2 }
 0xbe0   : > { %s1729_s20 = sand.u32 1, %s2882_s28  }
 0xbe1   : > { %p2111_p6 = pnand %p2114_p5, %p2499_p9  ;;  %s1730_s24 = scalar_lea.sflag [#allocation4], %s1729_s20 }
 0xbe3   : > { %p2112_p7 = pneg %p2111_p6 }
 0xbe5   : > { %2296 = dma.done.wait (%p2112_p7), %s1730_s24, 128  }
 0xbe6   : > { %2298 = vsyncadd (%p2112_p7), %s1730_s24, 4294967168  ;;  %s30_s30 = sadd.s32 1, %s2881_s17   ;;  %s2884_s24 = sld [smem:[#allocation7_spill]] }
 0xbe7   : > { %p27_p8 = scmp.ge.s32.totalorder %s30_s30, 6   ;;  %s2885_s25 = sld [smem:[#allocation8_spill]] }
 0xbe8   : > { %s2886_s26 = sld [smem:[#allocation18_spill]] }
 0xbe9   : > { %s2887_s27 = sld [smem:[#allocation11_spill]]  ;;  %29 = sbr.rel (!%p27_p8) target bundleno = 15 (0xf), region = 167 }
 0xbea   : > { %s2888_s28 = sld [smem:[#allocation12_spill]] }
 0xbeb   : > { %s2889_s29 = sld [smem:[#allocation14_spill]] }
 0xbec   : > { %s2890_s0 = sld [smem:[#allocation16_spill]] }
 0xbee   :  { %1735 = vsyncpa [#allocation4], 1 }
 0xbef   :  { %1737 = vsyncpa [#allocation4 + $0x1], 1 }

</bundles_post_ra>
